<compile_context>
chip_gen: v7x
topology: tpu7x:2x2x1
jax: 0.10.0
libtpu: 0.0.40
codegen_flags: <defaults>
</compile_context>

<pallas_src>
import math

import jax
import jax.numpy as jnp
from jax.experimental import pallas as pl
from jax.experimental.pallas import tpu as pltpu


def _round_up(x, m):
    return (x + m - 1) // m * m


def _vmem_limit_bytes():
    """Scoped-VMEM limit: ~3/4 of physical, capped at 100 MiB (=> ~96 MiB on
    v5e/v6e's 128 MiB, ~48 MiB on v7x's 64 MiB)."""
    phys = 64 * 1024 * 1024
    try:
        info = pltpu.get_tpu_info()
        phys = int(getattr(info, "vmem_capacity_bytes", phys))
    except Exception:
        pass
    return min(phys * 3 // 4, 100 * 1024 * 1024)


# ---------------------------------------------------------------------------
# Small-graph fast path: one fused kernel, everything VMEM-resident, f32 math.
# ---------------------------------------------------------------------------
def _fused_small_kernel(nodes_ref, adj_ref, lasth_ref, w1_ref, w2_ref, bias_ref,
                        out_ref):
    f32 = jnp.float32
    x = jnp.dot(lasth_ref[...].astype(f32), w2_ref[...].astype(f32),
                preferred_element_type=f32)
    aggre = jnp.dot(adj_ref[...].astype(f32), x, preferred_element_type=f32)
    own = jnp.dot(nodes_ref[...].astype(f32), w1_ref[...].astype(f32),
                  preferred_element_type=f32)
    out_ref[...] = (own + aggre + bias_ref[...].astype(f32)).astype(out_ref.dtype)


# ---------------------------------------------------------------------------
# Kernel 1 (hoisted out of the hot loop):  X = Last_Hidden @ W2  (bf16 output)
# ---------------------------------------------------------------------------
def _project_hidden_kernel(lasth_ref, w2_ref, x_ref):
    x_ref[...] = jnp.dot(
        lasth_ref[...].astype(x_ref.dtype),
        w2_ref[...].astype(x_ref.dtype),
        preferred_element_type=jnp.float32,
    ).astype(x_ref.dtype)


# ---------------------------------------------------------------------------
# Kernel 2 (hot loop):  Hidden[i] = Own[i] + sum_k Adj[i, k] @ X[k]  (+ bias)
# ---------------------------------------------------------------------------
def _make_aggregate_kernel(compute_dtype, tk, x_resident):
    def kernel(own_ref, adj_ref, x_ref, bias_ref, out_ref, acc_ref):
        k = pl.program_id(1)

        @pl.when(k == 0)
        def _init():
            # Seed the f32 accumulator with the pre-computed Own tile.
            acc_ref[...] = own_ref[...]

        if x_resident:
            # X is fully VMEM-resident (constant block index): slice the
            # reduction chunk in-kernel instead of re-streaming it from HBM
            # once per row tile.
            start = pl.multiple_of(k * tk, tk)
            x_tile = x_ref[pl.ds(start, tk), :]
        else:
            x_tile = x_ref[...]

        # FLOP-dominant term; adjacency tile cast in-kernel (no-op if the
        # caller already passes a bf16 adjacency), f32 accumulation.
        acc_ref[...] += jnp.dot(
            adj_ref[...].astype(compute_dtype), x_tile,
            preferred_element_type=jnp.float32)

        @pl.when(k == pl.num_programs(1) - 1)
        def _finalize():
            out_ref[...] = (acc_ref[...] + bias_ref[...]).astype(out_ref.dtype)

    return kernel


def aggregator_forward(
    nodes_feature,
    adjacency,
    last_hidden,
    weight_1,
    weight_2,
    bias=None,
    *,
    compute_dtype=jnp.bfloat16,
    tile_m=512,                      # multiple of 256 (v6e/v7x MXU)
    tile_k=2048,                     # multiple of 256; >=1 MiB bf16 adjacency tile
    x_resident_max_bytes=8 * 1024 * 1024,
    small_n_threshold=1024,
):
    """Fused, tiled Aggregator forward pass on TPU via Pallas."""
    n, f_origin = nodes_feature.shape
    f_in = last_hidden.shape[1]
    d_out = weight_1.shape[1]
    out_dtype = nodes_feature.dtype
    vmem_limit = _vmem_limit_bytes()

    bias_arr = (jnp.zeros((d_out,), jnp.float32) if bias is None
                else bias.astype(jnp.float32)).reshape(1, d_out)

    # -------------------- small-graph fast path ------------------------------
    if n <= small_n_threshold:
        return pl.pallas_call(
            _fused_small_kernel,
            out_shape=jax.ShapeDtypeStruct((n, d_out), out_dtype),
            grid_spec=pltpu.PrefetchScalarGridSpec(
                num_scalar_prefetch=0,
                grid=(1,),
                in_specs=[
                    pl.BlockSpec((n, f_origin), lambda i: (0, 0)),
                    pl.BlockSpec((n, n), lambda i: (0, 0)),
                    pl.BlockSpec((n, f_in), lambda i: (0, 0)),
                    pl.BlockSpec((f_origin, d_out), lambda i: (0, 0)),
                    pl.BlockSpec((f_in, d_out), lambda i: (0, 0)),
                    pl.BlockSpec((1, d_out), lambda i: (0, 0)),
                ],
                out_specs=pl.BlockSpec((n, d_out), lambda i: (0, 0)),
            ),
            compiler_params=pltpu.CompilerParams(
                dimension_semantics=("arbitrary",),
                vmem_limit_bytes=vmem_limit,
            ),
        )(nodes_feature, adjacency, last_hidden, weight_1, weight_2, bias_arr)

    # -------------------- large-graph tiled path -----------------------------
    # Tile selection (8/128-aligned; shrink for mid-sized graphs).
    tm = tile_m if n >= tile_m else _round_up(n, 8)
    tk = tile_k if n >= tile_k else _round_up(n, 128)
    # Megacore guard (v7x has 2 TCs): keep >= 4 row tiles whenever possible.
    while tm >= 512 and (n + tm - 1) // tm < 4:
        tm //= 2

    adj_itemsize = jnp.dtype(adjacency.dtype).itemsize
    out_itemsize = jnp.dtype(out_dtype).itemsize
    cd_itemsize = jnp.dtype(compute_dtype).itemsize

    x_resident = _round_up(n, tk) * d_out * cd_itemsize <= x_resident_max_bytes

    def vmem_estimate(tm_, tk_):
        n_k_ = _round_up(n, tk_)
        adj_b = 2 * tm_ * tk_ * adj_itemsize                   # double-buffered
        x_b = 2 * (n_k_ if x_resident else tk_) * d_out * cd_itemsize
        own_b = 2 * tm_ * d_out * 4
        out_b = 2 * tm_ * d_out * out_itemsize
        acc_b = tm_ * d_out * 4
        return adj_b + x_b + own_b + out_b + acc_b + (1 << 20)  # 1 MiB slack

    budget = int(vmem_limit * 0.8)
    while vmem_estimate(tm, tk) > budget and tk > 512:
        tk = max(512, _round_up(tk // 2, 128))
    while vmem_estimate(tm, tk) > budget and tm > 256:
        tm = max(256, _round_up(tm // 2, 8))

    n_rows = _round_up(n, tm)
    n_k = _round_up(n, tk)

    # Zero padding is algebraically neutral; only applied for tile-misaligned N.
    # Adjacency keeps its NATIVE dtype (no wrapper cast pass); callers with a
    # static graph should pass a cached bf16 adjacency (mandatory best-case on
    # v5e) and the in-kernel cast becomes a no-op.
    adj = adjacency
    if adj.shape != (n_rows, n_k):
        adj = jnp.pad(adj, ((0, n_rows - n), (0, n_k - n)))
    lasth = last_hidden
    if lasth.shape[0] != n_k:
        lasth = jnp.pad(lasth, ((0, n_k - n), (0, 0)))

    # Own = Nodes @ W1: negligible FLOPs -> plain XLA in f32, kept out of the
    # hot loop (frees VMEM, removes the skinny-K matmul and masked loads).
    own = jnp.dot(nodes_feature.astype(jnp.float32),
                  weight_1.astype(jnp.float32),
                  preferred_element_type=jnp.float32)
    if n_rows != n:
        own = jnp.pad(own, ((0, n_rows - n), (0, 0)))

    # X = Last_Hidden @ W2 (row-tiled, stored in compute dtype).
    x = pl.pallas_call(
        _project_hidden_kernel,
        out_shape=jax.ShapeDtypeStruct((n_k, d_out), compute_dtype),
        grid_spec=pltpu.PrefetchScalarGridSpec(
            num_scalar_prefetch=0,
            grid=(n_k // tk,),
            in_specs=[
                pl.BlockSpec((tk, f_in), lambda i: (i, 0)),
                pl.BlockSpec((f_in, d_out), lambda i: (0, 0)),
            ],
            out_specs=pl.BlockSpec((tk, d_out), lambda i: (i, 0)),
        ),
        compiler_params=pltpu.CompilerParams(
            dimension_semantics=("parallel",),
            vmem_limit_bytes=vmem_limit,
        ),
    )(lasth, weight_2)

    n_row_tiles = n_rows // tm
    n_k_tiles = n_k // tk

    if x_resident:
        x_spec = pl.BlockSpec((n_k, d_out), lambda i, k: (0, 0))
        x_reads = 1
    else:
        x_spec = pl.BlockSpec((tk, d_out), lambda i, k: (k, 0))
        x_reads = n_row_tiles

    cost = pl.CostEstimate(
        flops=2 * n_rows * n_k * d_out,
        transcendentals=0,
        bytes_accessed=(
            n_rows * n_k * adj_itemsize                   # adjacency stream
            + x_reads * n_k * d_out * cd_itemsize         # X (resident => once)
            + n_rows * d_out * 4                          # Own (f32)
            + n_rows * d_out * out_itemsize               # output
        ),
    )

    hidden_padded = pl.pallas_call(
        _make_aggregate_kernel(compute_dtype, tk, x_resident),
        out_shape=jax.ShapeDtypeStruct((n_rows, d_out), out_dtype),
        grid_spec=pltpu.PrefetchScalarGridSpec(
            num_scalar_prefetch=0,
            grid=(n_row_tiles, n_k_tiles),                # reduction axis last
            in_specs=[
                pl.BlockSpec((tm, d_out), lambda i, k: (i, 0)),   # Own (f32)
                pl.BlockSpec((tm, tk), lambda i, k: (i, k)),      # Adjacency
                x_spec,                                           # X
                pl.BlockSpec((1, d_out), lambda i, k: (0, 0)),    # bias
            ],
            out_specs=pl.BlockSpec((tm, d_out), lambda i, k: (i, 0)),
            scratch_shapes=[pltpu.VMEM((tm, d_out), jnp.float32)],
        ),
        compiler_params=pltpu.CompilerParams(
            dimension_semantics=("parallel", "arbitrary"),
            vmem_limit_bytes=vmem_limit,
        ),
        cost_estimate=cost,
    )(own, adj, x, bias_arr)

    return hidden_padded[:n] if n_rows != n else hidden_padded


def kaiming_uniform(key, shape, dtype=jnp.float32):
    """Deterministic stand-in for nn.init.kaiming_uniform_ (fan_in mode)."""
    fan_in = shape[1]  # PyTorch 2-D fan_in = size(1)
    bound = math.sqrt(6.0 / fan_in)
    return jax.random.uniform(key, shape, dtype, minval=-bound, maxval=bound)


if __name__ == "__main__":
    key = jax.random.PRNGKey(0)
    k_nodes, k_adj, k_hid, k_w1, k_w2, k_b = jax.random.split(key, 6)

    # --- Test 1: small, module-consistent shapes (fast path, f32 math) -------
    n_nodes, origin_featurenum, input_dims, output_dims = 64, 32, 16, 128
    nodes_feature = jax.random.normal(k_nodes, (n_nodes, origin_featurenum), jnp.float32)
    adjacency = jax.random.uniform(k_adj, (n_nodes, n_nodes), jnp.float32)
    last_hidden = jax.random.normal(k_hid, (n_nodes, input_dims), jnp.float32)
    weight_1 = kaiming_uniform(k_w1, (origin_featurenum, output_dims))
    weight_2 = kaiming_uniform(k_w2, (input_dims, output_dims))
    bias_vec = jax.random.normal(k_b, (output_dims,), jnp.float32) * 0.1

    out = jax.block_until_ready(
        aggregator_forward(nodes_feature, adjacency, last_hidden, weight_1, weight_2))
    assert out.shape == (n_nodes, output_dims)
    ref = nodes_feature @ weight_1 + adjacency @ (last_hidden @ weight_2)
    assert jnp.allclose(out, ref, atol=5e-2, rtol=5e-2)

    out_b = jax.block_until_ready(
        aggregator_forward(nodes_feature, adjacency, last_hidden, weight_1, weight_2,
                           bias=bias_vec))
    assert jnp.allclose(out_b, ref + bias_vec, atol=5e-2, rtol=5e-2)

    # --- Test 2: large tiled path, tile-aligned N (resident X, no padding) ---
    n2 = 2048
    kk = jax.random.split(jax.random.PRNGKey(1), 3)
    nodes2 = jax.random.normal(kk[0], (n2, origin_featurenum), jnp.float32)
    adj2 = jax.random.uniform(kk[1], (n2, n2), jnp.float32)
    hid2 = jax.random.normal(kk[2], (n2, input_dims), jnp.float32)

    out2 = jax.block_until_ready(
        aggregator_forward(nodes2, adj2, hid2, weight_1, weight_2))
    bf16 = jnp.bfloat16
    x2_bf = jnp.dot(hid2.astype(bf16), weight_2.astype(bf16),
                    preferred_element_type=jnp.float32).astype(bf16)
    ref2_bf = (nodes2 @ weight_1
               + jnp.dot(adj2.astype(bf16), x2_bf, preferred_element_type=jnp.float32))
    assert jnp.allclose(out2, ref2_bf, atol=2e-1, rtol=2e-2)
    ref2_f32 = nodes2 @ weight_1 + adj2 @ (hid2 @ weight_2)
    assert jnp.allclose(out2, ref2_f32, atol=1.0, rtol=1e-1)

    # --- Test 3: forced tiled path, awkward N (padding, streamed X, bias) ----
    n3 = 600
    kk3 = jax.random.split(jax.random.PRNGKey(2), 3)
    nodes3 = jax.random.normal(kk3[0], (n3, origin_featurenum), jnp.float32)
    adj3 = jax.random.uniform(kk3[1], (n3, n3), jnp.float32)
    hid3 = jax.random.normal(kk3[2], (n3, input_dims), jnp.float32)

    out3 = jax.block_until_ready(
        aggregator_forward(nodes3, adj3, hid3, weight_1, weight_2, bias=bias_vec,
                           small_n_threshold=0, tile_m=256, tile_k=512,
                           x_resident_max_bytes=0))
    x3_bf = jnp.dot(hid3.astype(bf16), weight_2.astype(bf16),
                    preferred_element_type=jnp.float32).astype(bf16)
    ref3_bf = (nodes3 @ weight_1
               + jnp.dot(adj3.astype(bf16), x3_bf, preferred_element_type=jnp.float32)
               + bias_vec)
    assert out3.shape == (n3, output_dims)
    assert jnp.allclose(out3, ref3_bf, atol=2e-1, rtol=2e-2)

    print("KERNEL_OK")
</pallas_src>

<mosaic_0001>
module attributes {stable_mosaic.version = 11 : i64} {
  func.func @_fused_small_kernel(%arg0: i32, %arg1: memref<64x32xf32, #tpu.memory_space<vmem>>, %arg2: memref<64x64xf32, #tpu.memory_space<vmem>>, %arg3: memref<64x16xf32, #tpu.memory_space<vmem>>, %arg4: memref<32x128xf32, #tpu.memory_space<vmem>>, %arg5: memref<16x128xf32, #tpu.memory_space<vmem>>, %arg6: memref<1x128xf32, #tpu.memory_space<vmem>>, %arg7: memref<64x128xf32, #tpu.memory_space<vmem>>) attributes {dimension_semantics = [#tpu.dimension_semantics<arbitrary>], iteration_bounds = array<i64: 1>, scalar_prefetch = 0 : i64, scratch_operands = 0 : i64, tpu.core_type = #tpu.core_type<tc>, window_params = [{pipeline_mode = #tpu.pipeline_mode<synchronous>, transform_indices = @transform_0, window_bounds = array<i64: 64, 32>}, {pipeline_mode = #tpu.pipeline_mode<synchronous>, transform_indices = @transform_1, window_bounds = array<i64: 64, 64>}, {pipeline_mode = #tpu.pipeline_mode<synchronous>, transform_indices = @transform_2, window_bounds = array<i64: 64, 16>}, {pipeline_mode = #tpu.pipeline_mode<synchronous>, transform_indices = @transform_3, window_bounds = array<i64: 32, 128>}, {pipeline_mode = #tpu.pipeline_mode<synchronous>, transform_indices = @transform_4, window_bounds = array<i64: 16, 128>}, {pipeline_mode = #tpu.pipeline_mode<synchronous>, transform_indices = @transform_5, window_bounds = array<i64: 1, 128>}, {pipeline_mode = #tpu.pipeline_mode<synchronous>, transform_indices = @transform_6, window_bounds = array<i64: 64, 128>}]} {
    %c0 = arith.constant 0 : index
    %c0_0 = arith.constant 0 : index
    %0 = vector.load %arg3[%c0, %c0_0] : memref<64x16xf32, #tpu.memory_space<vmem>>, vector<64x16xf32>
    %c0_1 = arith.constant 0 : index
    %c0_2 = arith.constant 0 : index
    %1 = vector.load %arg5[%c0_1, %c0_2] : memref<16x128xf32, #tpu.memory_space<vmem>>, vector<16x128xf32>
    %cst = arith.constant dense<0.000000e+00> : vector<64x128xf32>
    %2 = tpu.matmul %0, %1, %cst {dimension_numbers = #tpu.dot_dimension_numbers<[1], [0], [0], [1], [0, 0, 1, 1], [], []>} : vector<64x16xf32>, vector<16x128xf32>, vector<64x128xf32> -> vector<64x128xf32>
    %c0_3 = arith.constant 0 : index
    %c0_4 = arith.constant 0 : index
    %3 = vector.load %arg2[%c0_3, %c0_4] : memref<64x64xf32, #tpu.memory_space<vmem>>, vector<64x64xf32>
    %cst_5 = arith.constant dense<0.000000e+00> : vector<64x128xf32>
    %4 = tpu.matmul %3, %2, %cst_5 {dimension_numbers = #tpu.dot_dimension_numbers<[1], [0], [0], [1], [0, 0, 1, 1], [], []>} : vector<64x64xf32>, vector<64x128xf32>, vector<64x128xf32> -> vector<64x128xf32>
    %c0_6 = arith.constant 0 : index
    %c0_7 = arith.constant 0 : index
    %5 = vector.load %arg1[%c0_6, %c0_7] : memref<64x32xf32, #tpu.memory_space<vmem>>, vector<64x32xf32>
    %c0_8 = arith.constant 0 : index
    %c0_9 = arith.constant 0 : index
    %6 = vector.load %arg4[%c0_8, %c0_9] : memref<32x128xf32, #tpu.memory_space<vmem>>, vector<32x128xf32>
    %cst_10 = arith.constant dense<0.000000e+00> : vector<64x128xf32>
    %7 = tpu.matmul %5, %6, %cst_10 {dimension_numbers = #tpu.dot_dimension_numbers<[1], [0], [0], [1], [0, 0, 1, 1], [], []>} : vector<64x32xf32>, vector<32x128xf32>, vector<64x128xf32> -> vector<64x128xf32>
    %8 = arith.addf %7, %4 : vector<64x128xf32>
    %c0_11 = arith.constant 0 : index
    %c0_12 = arith.constant 0 : index
    %9 = vector.load %arg6[%c0_11, %c0_12] : memref<1x128xf32, #tpu.memory_space<vmem>>, vector<1x128xf32>
    %10 = vector.broadcast %9 : vector<1x128xf32> to vector<64x128xf32>
    %11 = arith.addf %8, %10 : vector<64x128xf32>
    %c0_13 = arith.constant 0 : index
    %c0_14 = arith.constant 0 : index
    %12 = vector.load %arg7[%c0_13, %c0_14] : memref<64x128xf32, #tpu.memory_space<vmem>>, vector<64x128xf32>
    tpu.vector_store %arg7[%c0_13, %c0_14], %11 {strides = array<i32>} : memref<64x128xf32, #tpu.memory_space<vmem>>, vector<64x128xf32>,
    return
  }
  func.func @transform_0(%arg0: i32) -> (i32, i32) {
    %c0_i32 = arith.constant 0 : i32
    %c0_i32_0 = arith.constant 0 : i32
    %c0_i32_1 = arith.constant 0 : i32
    return %c0_i32, %c0_i32_0 : i32, i32
  }
  func.func @transform_1(%arg0: i32) -> (i32, i32) {
    %c0_i32 = arith.constant 0 : i32
    %c0_i32_0 = arith.constant 0 : i32
    %c0_i32_1 = arith.constant 0 : i32
    return %c0_i32, %c0_i32_0 : i32, i32
  }
  func.func @transform_2(%arg0: i32) -> (i32, i32) {
    %c0_i32 = arith.constant 0 : i32
    %c0_i32_0 = arith.constant 0 : i32
    %c0_i32_1 = arith.constant 0 : i32
    return %c0_i32, %c0_i32_0 : i32, i32
  }
  func.func @transform_3(%arg0: i32) -> (i32, i32) {
    %c0_i32 = arith.constant 0 : i32
    %c0_i32_0 = arith.constant 0 : i32
    %c0_i32_1 = arith.constant 0 : i32
    return %c0_i32, %c0_i32_0 : i32, i32
  }
  func.func @transform_4(%arg0: i32) -> (i32, i32) {
    %c0_i32 = arith.constant 0 : i32
    %c0_i32_0 = arith.constant 0 : i32
    %c0_i32_1 = arith.constant 0 : i32
    return %c0_i32, %c0_i32_0 : i32, i32
  }
  func.func @transform_5(%arg0: i32) -> (i32, i32) {
    %c0_i32 = arith.constant 0 : i32
    %c0_i32_0 = arith.constant 0 : i32
    %c0_i32_1 = arith.constant 0 : i32
    return %c0_i32, %c0_i32_0 : i32, i32
  }
  func.func @transform_6(%arg0: i32) -> (i32, i32) {
    %c0_i32 = arith.constant 0 : i32
    %c0_i32_0 = arith.constant 0 : i32
    %c0_i32_1 = arith.constant 0 : i32
    return %c0_i32, %c0_i32_0 : i32, i32
  }
}

</mosaic_0001>

<bundles_post_ra>
// kernel: tpu_custom_call.1
= control target key start
LH: loop header
LB: loop body
LE: loop exit
PB: predicated region body
PF: predicated region fallthrough
CT: control target
= control target key end

     0   :  { %vm34_vm0 = vcmask 130048   ;;  %s840_s0 = inlined_call_operand.vmem [shape: f32[64,32], index: 0, kind: input, shape index: {}]   ;;  %s841_s1 = inlined_call_operand.vmem [shape: f32[64,64], index: 1, kind: input, shape index: {}]   ;;  %s842_s2 = inlined_call_operand.vmem [shape: f32[64,16], index: 2, kind: input, shape index: {}]   ;;  %s843_s3 = inlined_call_operand.vmem [shape: f32[32,128], index: 3, kind: input, shape index: {}]   ;;  %s844_s4 = inlined_call_operand.vmem [shape: f32[16,128], index: 4, kind: input, shape index: {}]   ;;  %s845_s5 = inlined_call_operand.vmem [shape: f32[1,128], index: 5, kind: input, shape index: {}]   ;;  %s846_s6 = inlined_call_operand.hbm [shape: f32[64,128], index: 6, kind: output, shape index: {}]  }
   0x1   :  { %v32_v0 = vld [vmem:[%s844_s4] sm:$0xff]  ;;  %v33_v1 = vld [vmem:[%s844_s4 + $0x8] sm:$0xff] }
   0x2   :  { %v24_v2 = vld [vmem:[%s842_s2] sm:$0xff]  ;;  %v610_v3 = vpack.c.bf16 %v33_v1, %v32_v0 }
   0x3   :  { %550 = vmatprep.mubr.msk.f32.mxu0 %vm34_vm0, %v24_v2 }
   0x4   :  { %611 = vmatprep.subr.bf16.mxu0 %v610_v3 }
   0x5   :  { %11 = vsyncpa [#allocation3], 0  ;;  %613 = vmatpush3.bf16.msra.mxu0 %v610_v3  ;;  %v25_v4 = vld [vmem:[%s842_s2 + $0x8] sm:$0xff]  ;;  %v26_v5 = vld [vmem:[%s842_s2 + $0x10] sm:$0xff]  ;;  %vm172_vm1 = vcmask 523264   ;;  %vm314_vm2 = vcmask 261120  }
   0x6   :  { %v27_v6 = vld [vmem:[%s842_s2 + $0x18] sm:$0xff]  ;;  %v28_v7 = vld [vmem:[%s842_s2 + $0x20] sm:$0xff]  ;;  %v29_v8 = vld [vmem:[%s842_s2 + $0x28] sm:$0xff] }
   0x7   :  { %v30_v9 = vld [vmem:[%s842_s2 + $0x30] sm:$0xff]  ;;  %v31_v10 = vld [vmem:[%s842_s2 + $0x38] sm:$0xff]  ;;  %v310_v11 = vld [vmem:[%s843_s3] sm:$0xff] }
   0x8   :  { %551 = vmatmul.mubr.msk.f32.vlgmr.msra.gmra.mrb[0].mxu0 %vm34_vm0, %v25_v4  ;;  %v311_v12 = vld [vmem:[%s843_s3 + $0x8] sm:$0xff]  ;;  %v312_v14 = vld [vmem:[%s843_s3 + $0x10] sm:$0xff]  ;;  %v313_v15 = vld [vmem:[%s843_s3 + $0x18] sm:$0xff] }
   0x9   :  { %553 = vmatprep.mubr.msk.f32.mxu0 %vm34_vm0, %v26_v5  ;;  %v630_v13 = vpack.c.bf16 %v311_v12, %v310_v11  ;;  %v634_v16 = vpack.c.bf16 %v313_v15, %v312_v14  ;;  %v164_v17 = vld [vmem:[%s841_s1] sm:$0xff]  ;;  %v303_v19 = vld [vmem:[%s840_s0 + $0x8] sm:$0xff]  ;;  %v304_v20 = vld [vmem:[%s840_s0 + $0x10] sm:$0xff] }
   0xa   :  { %v302_v18 = vld [vmem:[%s840_s0] sm:$0xff]  ;;  %v305_v21 = vld [vmem:[%s840_s0 + $0x18] sm:$0xff]  ;;  %v307_v23 = vld [vmem:[%s840_s0 + $0x28] sm:$0xff] }
   0xb   :  { %631 = vmatprep.subr.bf16.mxu1 %v630_v13  ;;  %598 = vmatprep.mubr.msk.f32.mxu1 %vm314_vm2, %v302_v18  ;;  %v306_v22 = vld [vmem:[%s840_s0 + $0x20] sm:$0xff]  ;;  %v308_v24 = vld [vmem:[%s840_s0 + $0x30] sm:$0xff]  ;;  %v309_v25 = vld [vmem:[%s840_s0 + $0x38] sm:$0xff] }
   0xc   :  { %554 = vmatmul.mubr.msk.f32.gmra.mrb[2].mxu0 %vm34_vm0, %v27_v6  ;;  %633 = vmatpush3.bf16.msra.mxu1 %v630_v13  ;;  %v165_v38 = vld [vmem:[%s841_s1 + $0x8] sm:$0xff]  ;;  %v166_v39 = vld [vmem:[%s841_s1 + $0x10] sm:$0xff]  ;;  %v167_v40 = vld [vmem:[%s841_s1 + $0x18] sm:$0xff] }
   0xd   :  { %556 = vmatprep.mubr.msk.f32.mxu0 %vm34_vm0, %v28_v7  ;;  %635 = vmatprep.subr.bf16.mxu1 %v634_v16  ;;  %v168_v41 = vld [vmem:[%s841_s1 + $0x20] sm:$0xff]  ;;  %v169_v42 = vld [vmem:[%s841_s1 + $0x28] sm:$0xff]  ;;  %v170_v43 = vld [vmem:[%s841_s1 + $0x30] sm:$0xff] }
   0xe   :  { %v171_v44 = vld [vmem:[%s841_s1 + $0x38] sm:$0xff]  ;;  %v507_v54 = vld [vmem:[%s845_s5] ss:$0 sm:$0xff]  ;;  %s673_s1 = smov [#allocation2]  }
   0xf   :  { %s472_s5 = sshll.u32 %s673_s1, 4  ;;  %s473_s5 = int_to_ptr.vmem [resolvable:$true] %s472_s5 }
  0x10   :  { %557 = vmatmul.mubr.msk.f32.gmra.mrb[4].mxu0 %vm34_vm0, %v29_v8  ;;  %637 = vmatpush3.bf16.msra.mxu1 %v634_v16  ;;  %s649_s3 = scalar_lea.vmem %s473_s5, 1024  ;;  %p654_p1 = scmp.lt.s32.totalorder %s473_s5, %s473_s5 }
  0x11   :  { %559 = vmatprep.mubr.msk.f32.mxu0 %vm34_vm0, %v30_v9  ;;  %p650_p0 = scmp.ne.s32.totalorder %s473_s5, %s649_s3  ;;  %p655_p2 = scmp.lt.s32.totalorder %s649_s3, %s649_s3 }
  0x13   :  { %599 = vmatmul.mubr.msk.f32.vlgmr.msra.gmra.mrb[0].mxu1 %vm314_vm2, %v303_v19  ;;  %p656_p3 = por %p655_p2, %p654_p1 }
  0x14   :  { %560 = vmatmul.mubr.msk.f32.gmra.mrb[6].mxu0 %vm34_vm0, %v31_v10  ;;  %601 = vmatprep.mubr.msk.f32.mxu1 %vm314_vm2, %v304_v20 }
  0x15   :  { %578 = vmatprep.mubr.msk.f32.mxu0 %vm172_vm1, %v164_v17  ;;  %p657_p4 = pnand %p656_p3, %p650_p0 }
  0x17   :  { %602 = vmatmul.mubr.msk.f32.gmra.mrb[2].mxu1 %vm314_vm2, %v305_v21 }
  0x18   :  { %604 = vmatprep.mubr.msk.f32.mxu1 %vm314_vm2, %v306_v22 }
  0x1b   :  { %605 = vmatmul.mubr.msk.f32.gmra.mrb[4].mxu1 %vm314_vm2, %v307_v23 }
  0x1c   :  { %607 = vmatprep.mubr.msk.f32.mxu1 %vm314_vm2, %v308_v24 }
  0x1f   :  { %608 = vmatmul.mubr.msk.f32.gmra.mrb[6].mxu1 %vm314_vm2, %v309_v25 }
  0xdb   :  { %v552_v26 = vpop.f32.mrb[0].mxu0 }
  0xdc   :  { %v125_v27 = vpop.f32.mrb[1].mxu0 }
  0xdd   :  { %v614_v28 = vpack.c.bf16 %v552_v26, %v125_v27 }
  0xdf   :  { %v555_v29 = vpop.f32.mrb[2].mxu0  ;;  %615 = vmatprep.subr.bf16.mxu0 %v614_v28 }
  0xe0   :  { %v135_v30 = vpop.f32.mrb[3].mxu0  ;;  %617 = vmatpush3.bf16.msra.mxu0 %v614_v28 }
  0xe1   :  { %v618_v31 = vpack.c.bf16 %v555_v29, %v135_v30 }
  0xe3   :  { %v558_v32 = vpop.f32.mrb[4].mxu0  ;;  %619 = vmatprep.subr.bf16.mxu0 %v618_v31 }
  0xe4   :  { %v145_v33 = vpop.f32.mrb[5].mxu0  ;;  %621 = vmatpush3.bf16.msra.mxu0 %v618_v31 }
  0xe5   :  { %v622_v34 = vpack.c.bf16 %v558_v32, %v145_v33 }
  0xe6   :  { %v600_v45 = vpop.f32.mrb[0].mxu1 }
  0xe7   :  { %v561_v35 = vpop.f32.mrb[6].mxu0  ;;  %623 = vmatprep.subr.bf16.mxu0 %v622_v34  ;;  %v405_v46 = vpop.f32.mrb[1].mxu1 }
  0xe8   :  { %v155_v36 = vpop.f32.mrb[7].mxu0  ;;  %625 = vmatpush3.bf16.msra.mxu0 %v622_v34 }
  0xe9   :  { %v626_v37 = vpack.c.bf16 %v561_v35, %v155_v36 }
  0xea   :  { %v603_v47 = vpop.f32.mrb[2].mxu1 }
  0xeb   :  { %627 = vmatprep.subr.bf16.mxu0 %v626_v37  ;;  %v415_v48 = vpop.f32.mrb[3].mxu1 }
  0xec   :  { %629 = vmatpush3.bf16.msra.mxu0 %v626_v37 }
  0xee   :  { %v606_v49 = vpop.f32.mrb[4].mxu1 }
  0xef   :  { %579 = vmatmul.mubr.msk.f32.vlgmr.msra.gmra.mrb[8].mxu0 %vm172_vm1, %v165_v38  ;;  %v425_v50 = vpop.f32.mrb[5].mxu1 }
  0xf0   :  { %581 = vmatprep.mubr.msk.f32.mxu0 %vm172_vm1, %v166_v39 }
  0xf2   :  { %v609_v51 = vpop.f32.mrb[6].mxu1 }
  0xf3   :  { %582 = vmatmul.mubr.msk.f32.gmra.mrb[10].mxu0 %vm172_vm1, %v167_v40  ;;  %v435_v52 = vpop.f32.mrb[7].mxu1 }
  0xf4   :  { %584 = vmatprep.mubr.msk.f32.mxu0 %vm172_vm1, %v168_v41 }
  0xf7   :  { %585 = vmatmul.mubr.msk.f32.gmra.mrb[12].mxu0 %vm172_vm1, %v169_v42 }
  0xf8   :  { %587 = vmatprep.mubr.msk.f32.mxu0 %vm172_vm1, %v170_v43 }
  0xfb   :  { %588 = vmatmul.mubr.msk.f32.gmra.mrb[14].mxu0 %vm172_vm1, %v171_v44 }
 0x1c2   :  { %v580_v53 = vpop.f32.mrb[8].mxu0 }
 0x1c3   :  { %v411_v55 = vadd.f32 %v600_v45, %v580_v53  ;;  %v263_v56 = vpop.f32.mrb[9].mxu0 }
 0x1c4   :  { %v406_v57 = vadd.f32 %v405_v46, %v263_v56 }
 0x1c5   :  { %v452_v58 = vadd.f32 %v507_v54, %v411_v55 }
 0x1c6   :  { %v451_v59 = vadd.f32 %v507_v54, %v406_v57  ;;  %v583_v60 = vpop.f32.mrb[10].mxu0 }
 0x1c7   :  { %460 = vst [vmem:[#allocation2 + $0x8] sm:$0xff] %v452_v58  ;;  %v421_v61 = vadd.f32 %v603_v47, %v583_v60  ;;  %v273_v62 = vpop.f32.mrb[11].mxu0 }
 0x1c8   :  { %459 = vst [vmem:[#allocation2] sm:$0xff] %v451_v59  ;;  %v416_v63 = vadd.f32 %v415_v48, %v273_v62 }
 0x1c9   :  { %v454_v0 = vadd.f32 %v507_v54, %v421_v61 }
 0x1ca   :  { %v453_v1 = vadd.f32 %v507_v54, %v416_v63  ;;  %v586_v2 = vpop.f32.mrb[12].mxu0 }
 0x1cb   :  { %462 = vst [vmem:[#allocation2 + $0x18] sm:$0xff] %v454_v0  ;;  %v431_v3 = vadd.f32 %v606_v49, %v586_v2  ;;  %v283_v4 = vpop.f32.mrb[13].mxu0 }
 0x1cc   :  { %461 = vst [vmem:[#allocation2 + $0x10] sm:$0xff] %v453_v1  ;;  %v426_v5 = vadd.f32 %v425_v50, %v283_v4 }
 0x1cd   :  { %v456_v6 = vadd.f32 %v507_v54, %v431_v3 }
 0x1ce   :  { %v455_v7 = vadd.f32 %v507_v54, %v426_v5  ;;  %v589_v8 = vpop.f32.mrb[14].mxu0 }
 0x1cf   :  { %464 = vst [vmem:[#allocation2 + $0x28] sm:$0xff] %v456_v6  ;;  %v441_v9 = vadd.f32 %v609_v51, %v589_v8  ;;  %v293_v10 = vpop.f32.mrb[15].mxu0 }
 0x1d0   :  { %463 = vst [vmem:[#allocation2 + $0x20] sm:$0xff] %v455_v7  ;;  %v436_v11 = vadd.f32 %v435_v52, %v293_v10 }
 0x1d1   :  { %v458_v12 = vadd.f32 %v507_v54, %v441_v9 }
 0x1d2   :  { %v457_v13 = vadd.f32 %v507_v54, %v436_v11 }
 0x1d3   :  { %466 = vst [vmem:[#allocation2 + $0x38] sm:$0xff] %v458_v12 }
 0x1d4   :  { %465 = vst [vmem:[#allocation2 + $0x30] sm:$0xff] %v457_v13 }
 0x1d5   :  { %660 = shalt.err (!%p657_p4)
}
 0x1d6   :  { %s661_s4 = scalar_lea.hbm %s846_s6, 1024 }
 0x1d7   :  { %p662_p5 = scmp.ne.s32.totalorder %s846_s6, %s661_s4  ;;  %p665_p6 = scmp.lt.u32.totalorder %s661_s4, %s846_s6 }
 0x1d9   :  { %p667_p7 = pnand %p665_p6, %p662_p5 }
 0x1db   :  { %670 = shalt.err (!%p667_p7)
}
 0x1dc   :  { %s674_s11 = smov 128   ;;  %s675_s12 = smov 8  }
 0x1dd   :  { %478 = dma.vmem_to_hbm [thread:$0]  %s473_s5, 1024, %s846_s6, [#allocation3], %s674_s11, %s674_s11, %s675_s12  }
 0x1de   :  { %671 = dma.done.wait [#allocation3], 1024  }
 0x1df   :  { %672 = vsyncadd [#allocation3], 4294966272 }
 0x1e0   :  { %482 = vsyncpa [#allocation3], 1 }

</bundles_post_ra>
